<compile_context>
chip_gen: v6e
topology: v6e:2x2x1
jax: 0.10.0
libtpu: 0.0.40
codegen_flags: <defaults>
</compile_context>

<pallas_src>
import functools

import jax
import jax.numpy as jnp
from jax.experimental import pallas as pl
from jax.experimental.pallas import tpu as pltpu


# ---------------------------------------------------------------------------
# Pallas kernel: fused (both backbones) conv-matmul + ReLU + pool + head.
# ---------------------------------------------------------------------------
def _fused_kernel(p_ref, w_ref, b_ref, wh_ref, bh_ref, out_ref, acc_ref, *,
                  inv_hw):
    """One (batch, hw-tile) grid step.

    p_ref  : [THW, KPAD]  bf16  fused im2col patches (S2 cols | S5P cols | 0-pad)
    w_ref  : [KPAD, FPAD] bf16  block-diagonal conv weights (S2 block / S5P block)
    b_ref  : [1, FPAD]    f32   fused conv biases (zeros in padded lanes)
    wh_ref : [FPAD, OUT]  f32   head weight (zero rows for padded feature lanes)
    bh_ref : [1, OUT]     f32   head bias
    out_ref: [1, OUT]     f32   regression output for this batch element
    acc_ref: [1, FPAD]    f32   per-batch pooled-sum accumulator (VMEM scratch)
    """
    t = pl.program_id(1)

    @pl.when(t == 0)
    def _init():
        acc_ref[...] = jnp.zeros_like(acc_ref)

    # Single lane-dense bf16 MXU matmul covers BOTH backbones (block-diagonal
    # weight): output cols [0:F) are S2 features, [F:2F) are S5P features,
    # [2F:FPAD) are dead zero lanes.
    a = jnp.dot(p_ref[...], w_ref[...],
                preferred_element_type=jnp.float32)           # [THW, FPAD] f32
    a = jnp.maximum(a + b_ref[...], 0.0)                      # bias + ReLU (f32)
    acc_ref[...] += jnp.sum(a, axis=0, keepdims=True)         # pooled sum (XLU)

    @pl.when(t == pl.num_programs(1) - 1)
    def _finalize():
        feat = acc_ref[...] * inv_hw                          # global avg pool
        out = jnp.dot(feat, wh_ref[...],
                      preferred_element_type=jnp.float32) + bh_ref[...]
        out_ref[...] = out.astype(out_ref.dtype)


def multi_backbone_regression_head(patches, w_fused, b_fused, w_head, b_head,
                                   *, hw_tile=128):
    """patches: [B, HW, KPAD] bf16 fused patch matrix -> [B, OUT] f32."""
    B, HW, KPAD = patches.shape
    FPAD, OUT = w_head.shape
    assert HW % hw_tile == 0, (HW, hw_tile)
    n_hw = HW // hw_tile

    kernel = functools.partial(_fused_kernel, inv_hw=1.0 / HW)

    out = pl.pallas_call(
        kernel,
        out_shape=jax.ShapeDtypeStruct((B, 1, OUT), jnp.float32),
        grid=(B, n_hw),
        in_specs=[
            pl.BlockSpec((pl.Squeezed(), hw_tile, KPAD), lambda b, t: (b, t, 0)),
            pl.BlockSpec((KPAD, FPAD), lambda b, t: (0, 0)),
            pl.BlockSpec((1, FPAD), lambda b, t: (0, 0)),
            pl.BlockSpec((FPAD, OUT), lambda b, t: (0, 0)),
            pl.BlockSpec((1, OUT), lambda b, t: (0, 0)),
        ],
        out_specs=pl.BlockSpec((pl.Squeezed(), 1, OUT), lambda b, t: (b, 0, 0)),
        scratch_shapes=[pltpu.VMEM((1, FPAD), jnp.float32)],
        compiler_params=pltpu.CompilerParams(
            dimension_semantics=("parallel", "arbitrary")),
    )(patches, w_fused, b_fused, w_head, b_head)
    return out.reshape(B, OUT)


# ---------------------------------------------------------------------------
# Plain-JAX glue: im2col + weight packing (layout prep only, no hot compute).
# ---------------------------------------------------------------------------
def im2col_3x3_same(x_nchw):
    """[B, C, H, W] -> [B, H*W, C*9]; patch columns ordered (C, kh, kw)."""
    B, C, H, W = x_nchw.shape
    xp = jnp.pad(x_nchw, ((0, 0), (0, 0), (1, 1), (1, 1)))
    cols = []
    for kh in range(3):
        for kw in range(3):
            cols.append(xp[:, :, kh:kh + H, kw:kw + W])      # [B, C, H, W]
    patches = jnp.stack(cols, axis=2)                        # [B, C, 9, H, W]
    patches = patches.transpose(0, 3, 4, 1, 2)               # [B, H, W, C, 9]
    return patches.reshape(B, H * W, C * 9)


def build_fused_patches(img, s5p, kpad):
    """Pack S2 and S5P patch matrices along K and pad to KPAD, cast bf16."""
    p2 = im2col_3x3_same(img)                                # [B, HW, k2]
    p5 = im2col_3x3_same(s5p)                                # [B, HW, k5]
    B, HW, k2 = p2.shape
    k5 = p5.shape[-1]
    p = jnp.zeros((B, HW, kpad), jnp.float32)
    p = p.at[:, :, :k2].set(p2)
    p = p.at[:, :, k2:k2 + k5].set(p5)
    return p.astype(jnp.bfloat16)


def build_fused_params(w_s2_conv, b_s2, w_s5p_conv, b_s5p, w_head, b_head,
                       kpad, fpad):
    """Block-diagonal conv weight [KPAD, FPAD], fused bias, padded head weight."""
    F, C2 = w_s2_conv.shape[0], w_s2_conv.shape[1]
    C5 = w_s5p_conv.shape[1]
    k2, k5 = C2 * 9, C5 * 9
    out_dim = w_head.shape[1]
    assert k2 + k5 <= kpad and 2 * F <= fpad

    w2 = w_s2_conv.reshape(F, k2).T                          # [k2, F]
    w5 = w_s5p_conv.reshape(F, k5).T                         # [k5, F]
    w_fused = jnp.zeros((kpad, fpad), jnp.float32)
    w_fused = w_fused.at[:k2, :F].set(w2)
    w_fused = w_fused.at[k2:k2 + k5, F:2 * F].set(w5)

    b_fused = jnp.zeros((1, fpad), jnp.float32)
    b_fused = b_fused.at[:, :F].set(b_s2)
    b_fused = b_fused.at[:, F:2 * F].set(b_s5p)

    wh = jnp.zeros((fpad, out_dim), jnp.float32)
    wh = wh.at[:2 * F, :].set(w_head)

    return w_fused.astype(jnp.bfloat16), b_fused, wh, b_head


# ---------------------------------------------------------------------------
# Driver
# ---------------------------------------------------------------------------
if __name__ == "__main__":
    B, C_S2, C_S5P, H, W, F, OUT = 2, 4, 1, 16, 16, 32, 1
    KPAD = ((C_S2 * 9 + C_S5P * 9 + 7) // 8) * 8             # 45 -> 48
    FPAD = 128                                               # lane-dense features

    key = jax.random.PRNGKey(0)
    k_img, k_s5p, kw2, kb2, kw5, kb5, kwh, kbh = jax.random.split(key, 8)

    # Inputs (the module's forward takes a dict {'img': ..., 's5p': ...}).
    img = jax.random.normal(k_img, (B, C_S2, H, W), dtype=jnp.float32)
    s5p = jax.random.normal(k_s5p, (B, C_S5P, H, W), dtype=jnp.float32)

    # Deterministic synthetic parameters.
    w_s2_conv = 0.1 * jax.random.normal(kw2, (F, C_S2, 3, 3), dtype=jnp.float32)
    b_s2 = 0.1 * jax.random.normal(kb2, (1, F), dtype=jnp.float32)
    w_s5p_conv = 0.1 * jax.random.normal(kw5, (F, C_S5P, 3, 3), dtype=jnp.float32)
    b_s5p = 0.1 * jax.random.normal(kb5, (1, F), dtype=jnp.float32)
    w_head = 0.1 * jax.random.normal(kwh, (2 * F, OUT), dtype=jnp.float32)
    b_head = 0.1 * jax.random.normal(kbh, (1, OUT), dtype=jnp.float32)

    # Layout prep: fused bf16 patch matrix + block-diagonal weights.
    patches = build_fused_patches(img, s5p, KPAD)            # [B, 256, 48] bf16
    w_fused, b_fused, wh, bh = build_fused_params(
        w_s2_conv, b_s2, w_s5p_conv, b_s5p, w_head, b_head, KPAD, FPAD)

    out = multi_backbone_regression_head(
        patches, w_fused, b_fused, wh, bh, hw_tile=128)
    out = jax.block_until_ready(out)

    # Pure-JAX f32 reference (exact module semantics: two backbones, cat, head).
    def ref_forward():
        p2 = im2col_3x3_same(img)
        p5 = im2col_3x3_same(s5p)
        w2 = w_s2_conv.reshape(F, -1).T
        w5 = w_s5p_conv.reshape(F, -1).T
        a2 = jnp.maximum(
            jnp.einsum('bhp,pf->bhf', p2, w2) + b_s2[:, None, :], 0.0)
        f2 = jnp.mean(a2, axis=1)
        a5 = jnp.maximum(
            jnp.einsum('bhp,pf->bhf', p5, w5) + b_s5p[:, None, :], 0.0)
        f5 = jnp.mean(a5, axis=1)
        feat = jnp.concatenate([f2, f5], axis=1)
        return feat @ w_head + b_head

    ref = jax.block_until_ready(ref_forward())
    assert out.shape == (B, OUT), out.shape
    # bf16 matmul inputs with f32 accumulation -> small quantization error.
    assert jnp.allclose(out, ref, atol=2e-2, rtol=2e-2), (out, ref)

    print("KERNEL_OK")
</pallas_src>

<mosaic_0001>
module attributes {stable_mosaic.version = 11 : i64} {
  func.func @_fused_kernel(%arg0: i32, %arg1: i32, %arg2: memref<1x128x48xbf16, #tpu.memory_space<vmem>>, %arg3: memref<48x128xbf16, #tpu.memory_space<vmem>>, %arg4: memref<1x128xf32, #tpu.memory_space<vmem>>, %arg5: memref<128x1xf32, #tpu.memory_space<vmem>>, %arg6: memref<1x1xf32, #tpu.memory_space<vmem>>, %arg7: memref<1x1x1xf32, #tpu.memory_space<vmem>>, %arg8: memref<1x128xf32, #tpu.memory_space<vmem>>) attributes {dimension_semantics = [#tpu.dimension_semantics<parallel>, #tpu.dimension_semantics<arbitrary>], iteration_bounds = array<i64: 2, 2>, scalar_prefetch = 0 : i64, scratch_operands = 1 : i64, tpu.core_type = #tpu.core_type<tc>, window_params = [{transform_indices = @transform_0, window_bounds = array<i64: 1, 128, 48>}, {pipeline_mode = #tpu.pipeline_mode<synchronous>, transform_indices = @transform_1, window_bounds = array<i64: 48, 128>}, {pipeline_mode = #tpu.pipeline_mode<synchronous>, transform_indices = @transform_2, window_bounds = array<i64: 1, 128>}, {pipeline_mode = #tpu.pipeline_mode<synchronous>, transform_indices = @transform_3, window_bounds = array<i64: 128, 1>}, {pipeline_mode = #tpu.pipeline_mode<synchronous>, transform_indices = @transform_4, window_bounds = array<i64: 1, 1>}, {transform_indices = @transform_5, window_bounds = array<i64: 1, 1, 1>}]} {
    %c0_i32 = arith.constant 0 : i32
    %0 = arith.cmpi eq, %arg1, %c0_i32 : i32
    %1 = arith.extui %0 : i1 to i32
    %c0_i32_0 = arith.constant 0 : i32
    %2 = arith.cmpi ne, %1, %c0_i32_0 : i32
    scf.if %2 {
      %cst_14 = arith.constant 0.000000e+00 : f32
      %20 = vector.broadcast %cst_14 : f32 to vector<1x128xf32>
      %c0_15 = arith.constant 0 : index
      %c0_16 = arith.constant 0 : index
      %21 = vector.load %arg8[%c0_15, %c0_16] : memref<1x128xf32, #tpu.memory_space<vmem>>, vector<1x128xf32>
      tpu.vector_store %arg8[%c0_15, %c0_16], %20 {strides = array<i32>} : memref<1x128xf32, #tpu.memory_space<vmem>>, vector<1x128xf32>,
    } else {
    }
    %c0 = arith.constant 0 : index
    %c0_1 = arith.constant 0 : index
    %c0_2 = arith.constant 0 : index
    %3 = vector.load %arg2[%c0, %c0_1, %c0_2] : memref<1x128x48xbf16, #tpu.memory_space<vmem>>, vector<1x128x48xbf16>
    %4 = vector.shape_cast %3 : vector<1x128x48xbf16> to vector<128x48xbf16>
    %c0_3 = arith.constant 0 : index
    %c0_4 = arith.constant 0 : index
    %5 = vector.load %arg3[%c0_3, %c0_4] : memref<48x128xbf16, #tpu.memory_space<vmem>>, vector<48x128xbf16>
    %cst = arith.constant dense<0.000000e+00> : vector<128x128xf32>
    %6 = tpu.matmul %4, %5, %cst {dimension_numbers = #tpu.dot_dimension_numbers<[1], [0], [0], [1], [0, 0, 1, 1], [], []>} : vector<128x48xbf16>, vector<48x128xbf16>, vector<128x128xf32> -> vector<128x128xf32>
    %c0_5 = arith.constant 0 : index
    %c0_6 = arith.constant 0 : index
    %7 = vector.load %arg4[%c0_5, %c0_6] : memref<1x128xf32, #tpu.memory_space<vmem>>, vector<1x128xf32>
    %8 = vector.broadcast %7 : vector<1x128xf32> to vector<128x128xf32>
    %9 = arith.addf %6, %8 : vector<128x128xf32>
    %cst_7 = arith.constant 0.000000e+00 : f32
    %10 = vector.broadcast %cst_7 : f32 to vector<128x128xf32>
    %11 = arith.maximumf %9, %10 : vector<128x128xf32>
    %c0_8 = arith.constant 0 : index
    %c0_9 = arith.constant 0 : index
    %12 = vector.load %arg8[%c0_8, %c0_9] : memref<1x128xf32, #tpu.memory_space<vmem>>, vector<1x128xf32>
    %cst_10 = arith.constant dense<0.000000e+00> : vector<128xf32>
    %13 = vector.multi_reduction <add>, %11, %cst_10 [0] : vector<128x128xf32> to vector<128xf32>
    %14 = vector.shape_cast %13 : vector<128xf32> to vector<1x128xf32>
    %15 = arith.addf %12, %14 : vector<1x128xf32>
    %c0_11 = arith.constant 0 : index
    %c0_12 = arith.constant 0 : index
    %16 = vector.load %arg8[%c0_11, %c0_12] : memref<1x128xf32, #tpu.memory_space<vmem>>, vector<1x128xf32>
    tpu.vector_store %arg8[%c0_11, %c0_12], %15 {strides = array<i32>} : memref<1x128xf32, #tpu.memory_space<vmem>>, vector<1x128xf32>,
    %c1_i32 = arith.constant 1 : i32
    %17 = arith.cmpi eq, %arg1, %c1_i32 : i32
    %18 = arith.extui %17 : i1 to i32
    %c0_i32_13 = arith.constant 0 : i32
    %19 = arith.cmpi ne, %18, %c0_i32_13 : i32
    scf.if %19 {
      %c0_14 = arith.constant 0 : index
      %c0_15 = arith.constant 0 : index
      %20 = vector.load %arg8[%c0_14, %c0_15] : memref<1x128xf32, #tpu.memory_space<vmem>>, vector<1x128xf32>
      %cst_16 = arith.constant 3.906250e-03 : f32
      %21 = vector.broadcast %cst_16 : f32 to vector<1x128xf32>
      %22 = arith.mulf %20, %21 : vector<1x128xf32>
      %c0_17 = arith.constant 0 : index
      %c0_18 = arith.constant 0 : index
      %23 = vector.load %arg5[%c0_17, %c0_18] : memref<128x1xf32, #tpu.memory_space<vmem>>, vector<128x1xf32>
      %cst_19 = arith.constant dense<0.000000e+00> : vector<1x1xf32>
      %24 = tpu.matmul %22, %23, %cst_19 {dimension_numbers = #tpu.dot_dimension_numbers<[1], [0], [0], [1], [0, 0, 1, 1], [], []>} : vector<1x128xf32>, vector<128x1xf32>, vector<1x1xf32> -> vector<1x1xf32>
      %c0_20 = arith.constant 0 : index
      %c0_21 = arith.constant 0 : index
      %25 = vector.load %arg6[%c0_20, %c0_21] : memref<1x1xf32, #tpu.memory_space<vmem>>, vector<1x1xf32>
      %26 = arith.addf %24, %25 : vector<1x1xf32>
      %c0_22 = arith.constant 0 : index
      %c0_23 = arith.constant 0 : index
      %c0_24 = arith.constant 0 : index
      %27 = vector.load %arg7[%c0_22, %c0_23, %c0_24] : memref<1x1x1xf32, #tpu.memory_space<vmem>>, vector<1x1x1xf32>
      %28 = vector.shape_cast %27 : vector<1x1x1xf32> to vector<1x1xf32>
      %29 = vector.shape_cast %26 : vector<1x1xf32> to vector<1x1x1xf32>
      tpu.vector_store %arg7[%c0_22, %c0_23, %c0_24], %29 {strides = array<i32>} : memref<1x1x1xf32, #tpu.memory_space<vmem>>, vector<1x1x1xf32>,
    } else {
    }
    return
  }
  func.func @transform_0(%arg0: i32, %arg1: i32) -> (i32, i32, i32) {
    %c0_i32 = arith.constant 0 : i32
    %c0_i32_0 = arith.constant 0 : i32
    return %arg0, %arg1, %c0_i32 : i32, i32, i32
  }
  func.func @transform_1(%arg0: i32, %arg1: i32) -> (i32, i32) {
    %c0_i32 = arith.constant 0 : i32
    %c0_i32_0 = arith.constant 0 : i32
    %c0_i32_1 = arith.constant 0 : i32
    return %c0_i32, %c0_i32_0 : i32, i32
  }
  func.func @transform_2(%arg0: i32, %arg1: i32) -> (i32, i32) {
    %c0_i32 = arith.constant 0 : i32
    %c0_i32_0 = arith.constant 0 : i32
    %c0_i32_1 = arith.constant 0 : i32
    return %c0_i32, %c0_i32_0 : i32, i32
  }
  func.func @transform_3(%arg0: i32, %arg1: i32) -> (i32, i32) {
    %c0_i32 = arith.constant 0 : i32
    %c0_i32_0 = arith.constant 0 : i32
    %c0_i32_1 = arith.constant 0 : i32
    return %c0_i32, %c0_i32_0 : i32, i32
  }
  func.func @transform_4(%arg0: i32, %arg1: i32) -> (i32, i32) {
    %c0_i32 = arith.constant 0 : i32
    %c0_i32_0 = arith.constant 0 : i32
    %c0_i32_1 = arith.constant 0 : i32
    return %c0_i32, %c0_i32_0 : i32, i32
  }
  func.func @transform_5(%arg0: i32, %arg1: i32) -> (i32, i32, i32) {
    %c0_i32 = arith.constant 0 : i32
    %c0_i32_0 = arith.constant 0 : i32
    %c0_i32_1 = arith.constant 0 : i32
    return %arg0, %c0_i32, %c0_i32_0 : i32, i32, i32
  }
}

</mosaic_0001>

<bundles_post_ra>
// kernel: tpu_custom_call.1
= control target key start
LH: loop header
LB: loop body
LE: loop exit
PB: predicated region body
PF: predicated region fallthrough
CT: control target
= control target key end

     0   :  { %s918_s20 = smov 0   ;;  %s920_s21 = smov 0   ;;  %s1061_s0 = inlined_call_operand.vmem [shape: bf16[2,256,48], index: 0, kind: input, shape index: {}]   ;;  %s1062_s1 = inlined_call_operand.vmem [shape: bf16[48,128], index: 1, kind: input, shape index: {}]   ;;  %s1063_s2 = inlined_call_operand.vmem [shape: f32[1,128], index: 2, kind: input, shape index: {}]   ;;  %s1064_s3 = inlined_call_operand.vmem [shape: f32[128,1], index: 3, kind: input, shape index: {}]   ;;  %s1065_s4 = inlined_call_operand.<no memory space> [shape: f32[1,1], index: 4, kind: input, shape index: {}]   ;;  %s1066_s5 = inlined_call_operand.vmem [shape: f32[2,1,1], index: 5, kind: output, shape index: {}]  }
   0x1   :  { %v10_v0 = vstv %s1065_s4  ;;  %s922_s22 = smov 0   ;;  %s924_s23 = smov 0  }
   0x2   :  { %11 = vst [vmem:[#allocation3] sm:$0x1] %v10_v0  ;;  %s926_s24 = smov 0  }
   0x3 LB: > { %s26_s4 = sadd.s32 1, %s872_s22  ;;  %s29_s25 = sadd.s32 1, %s876_s23  ;;  %s880_s24 = sphi %s926_s24, %s17_s24   ;;  %s876_s23 = sphi %s924_s23, %s1070_s23   ;;  %s872_s22 = sphi %s922_s22, %s1069_s22   ;;  %s868_s21 = sphi %s920_s21, %s1068_s21   ;;  %s864_s20 = sphi %s918_s20, %s1067_s20  }
   0x4   : > { %p27_p0 = scmp.ge.s32.totalorder %s26_s4, 2  ;;  %p669_p1 = scmp.ge.s32.totalorder %s880_s24, 1 }
   0x5   : > { %p208_p2 = scmp.lt.s32.totalorder %s880_s24, 5 }
   0x6   : > { %s1072_s4 = smov (%p27_p0, %s26_s4), 0  ;;  %s1074_s25 = smov (!%p27_p0, %s29_s25), %s876_s23 }
   0x7   : > { %p209_p3 = pnand %p669_p1, %p208_p2  ;;  %p31_p4 = scmp.ge.s32.totalorder %s1074_s25, 2 }
   0x8   : > { %s670_s26 = sshll.u32 (!%p209_p3), %s864_s20, 4  ;;  %p239_p5 = scmp.lt.s32.totalorder (!%p209_p3), %s868_s21, 1 }
   0x9   : > { %s1076_s25 = smov (%p31_p4, %s1074_s25), 0  ;;  %212 = sbr.rel (%p209_p3) target bundleno = 513 (0x201), region = 40 }
   0xa   : > { %p241_p6 = scmp.lt.s32.totalorder (!%p209_p3), %s670_s26, 31  ;;  %p673_p7 = scmp.ne.s32.totalorder (!%p209_p3), %s864_s20, 0 }
   0xe   : > { %s1078_s21 = smov (!%p239_p5, %s868_s21), 1  ;;  %s1080_s26 = smov (!%p241_p6, %s670_s26), 31 }
   0xf   : > { %s671_s27 = sshll.u32 %s1078_s21, 5  ;;  %s250_s30 = scalar_lea.vmem %s1066_s5, %s1078_s21 }
  0x10   : > { %s244_s6 = sadd.s32 %s671_s27, %s1080_s26  ;;  %255 = sbr.rel (%p673_p7) target bundleno = 23 (0x17), region = 44 }
  0x11   : > { %s672_s7 = sshll.u32 %s244_s6, 2 }
  0x12   : > { %s961_s10 = scalar_lea.vmem %s1061_s0, %s672_s7 }
  0x15   : > { %v882_v1 = vmov 0.0  }
  0x16   : > { %256 = vst [vmem:[#allocation2] sm:$0x1] %v882_v1 }
  0x17 PF: > { %v831_v2 = vld [vmem:[%s1062_s1 + $0x10] sm:$0xff]   ;;  %v832_v3 = vld [vmem:[%s1062_s1 + $0x8] sm:$0xff]   ;;  %vm344_vm0 = vcmask 392192   ;;  %v834_v4 = vld [vmem:[%s961_s10] sm:$0xff]   ;;  %p694_p8 = scmp.ne.s32.totalorder %s864_s20, 1 }
  0x18   : > { %725 = vmatprep.subr.bf16.mxu0 %v831_v2  ;;  %782 = vmatprep.subr.bf16.mxu1 %v831_v2  ;;  %v833_v5 = vld [vmem:[%s1062_s1] sm:$0xff]   ;;  %v835_v7 = vld [vmem:[%s961_s10 + $0x8] sm:$0xff]   ;;  %v836_v9 = vld [vmem:[%s961_s10 + $0x10] sm:$0xff]  }
  0x19   : > { %726 = vmatpush3.bf16.msra.mxu0 %v831_v2  ;;  %785 = vmatpush3.bf16.msra.mxu1 %v831_v2  ;;  %v838_v6 = vld [vmem:[%s961_s10 + $0x20] sm:$0xff]   ;;  %v839_v8 = vld [vmem:[%s961_s10 + $0x28] sm:$0xff]   ;;  %v840_v10 = vld [vmem:[%s961_s10 + $0x30] sm:$0xff]  }
  0x1a   : > { %727 = vmatprep.subr.bf16.mxu0 %v832_v3  ;;  %783 = vmatprep.subr.bf16.mxu1 %v832_v3  ;;  %v837_v11 = vld [vmem:[%s961_s10 + $0x18] sm:$0xff]   ;;  %v674_v17 = vld [vmem:[%s1063_s2] ss:$0 sm:$0xff] }
  0x1b   : > { %731 = vmatprep.mubr.msk.bf16.mxu0 %vm344_vm0, %v834_v4  ;;  %739 = vmatprep.mubr.msk.bf16.mxu1 %vm344_vm0, %v838_v6  ;;  %v841_v12 = vld [vmem:[%s961_s10 + $0x38] sm:$0xff]  }
  0x1d   : > { %728 = vmatpush3.bf16.msra.mxu0 %v832_v3  ;;  %786 = vmatpush3.bf16.msra.mxu1 %v832_v3 }
  0x1e   : > { %729 = vmatprep.subr.bf16.mxu0 %v833_v5  ;;  %784 = vmatprep.subr.bf16.mxu1 %v833_v5 }
  0x21   : > { %730 = vmatpush3.bf16.msra.mxu0 %v833_v5  ;;  %787 = vmatpush3.bf16.msra.mxu1 %v833_v5 }
  0x24   : > { %732 = vmatmul.mubr.msk.bf16.vlgmr.msra.gmra.mxu0 %vm344_vm0, %v835_v7  ;;  %740 = vmatmul.mubr.msk.bf16.vlgmr.msra.gmra.mxu1 %vm344_vm0, %v839_v8 }
  0x25   : > { %735 = vmatprep.mubr.msk.bf16.mxu0 %vm344_vm0, %v836_v9  ;;  %743 = vmatprep.mubr.msk.bf16.mxu1 %vm344_vm0, %v840_v10 }
  0x2c   : > { %736 = vmatmul.mubr.msk.bf16.gmra.mxu0 %vm344_vm0, %v837_v11  ;;  %744 = vmatmul.mubr.msk.bf16.gmra.mxu1 %vm344_vm0, %v841_v12 }
  0xe4   : > { %v733_v13 = vpop.f32.mrf.mxu0  ;;  %v741_v14 = vpop.f32.mrf.mxu1 }
  0xe5   : > { %v412_v22 = vadd.f32 %v733_v13, %v674_v17  ;;  %v444_v53 = vadd.f32 %v741_v14, %v674_v17 }
  0xe6   : > { %v403_v15 = vpop.f32.mrf.mxu0  ;;  %v435_v16 = vpop.f32.mrf.mxu1 }
  0xe7   : > { %v404_v19 = vadd.f32 %v674_v17, %v403_v15  ;;  %v468_v30 = vmax.f32 %v412_v22, 0.0  ;;  %v436_v47 = vadd.f32 %v674_v17, %v435_v16  ;;  %v476_v60 = vmax.f32 %v444_v53, 0.0 }
  0xe8   : > { %v734_v18 = vpop.f32.mrf.mxu0  ;;  %v742_v21 = vpop.f32.mrf.mxu1 }
  0xe9   : > { %v466_v25 = vmax.f32 %v404_v19, 0.0  ;;  %v415_v26 = vadd.f32 %v734_v18, %v674_v17  ;;  %v474_v54 = vmax.f32 %v436_v47, 0.0  ;;  %v447_v56 = vadd.f32 %v742_v21, %v674_v17  ;;  %v482_v19 = vld [vmem:[#allocation2] sm:$0x1] }
  0xea   : > { %v406_v20 = vpop.f32.mrf.mxu0  ;;  %v438_v29 = vpop.f32.mrf.mxu1 }
  0xeb   : > { %v407_v23 = vadd.f32 %v674_v17, %v406_v20  ;;  %v469_v34 = vmax.f32 %v415_v26, 0.0  ;;  %v439_v51 = vadd.f32 %v674_v17, %v438_v29  ;;  %v477_v63 = vmax.f32 %v447_v56, 0.0 }
  0xec   : > { %v737_v24 = vpop.f32.mrf.mxu0  ;;  %v745_v37 = vpop.f32.mrf.mxu1 }
  0xed   : > { %v467_v27 = vmax.f32 %v407_v23, 0.0  ;;  %v428_v38 = vadd.f32 %v737_v24, %v674_v17  ;;  %v475_v57 = vmax.f32 %v439_v51, 0.0  ;;  %v460_v2 = vadd.f32 %v745_v37, %v674_v17 }
  0xee   : > { %v419_v28 = vpop.f32.mrf.mxu0  ;;  %v451_v45 = vpop.f32.mrf.mxu1 }
  0xef   : > { %v483_v31 = vadd.f32 %v467_v27, %v466_v25  ;;  %v420_v32 = vadd.f32 %v674_v17, %v419_v28  ;;  %v472_v46 = vmax.f32 %v428_v38, 0.0  ;;  %v452_v62 = vadd.f32 %v674_v17, %v451_v45 }
  0xf0   : > { %v738_v33 = vpop.f32.mrf.mxu0  ;;  %v746_v52 = vpop.f32.mrf.mxu1  ;;  %v480_v8 = vmax.f32 %v460_v2, 0.0 }
  0xf1   : > { %v484_v35 = vadd.f32 %v483_v31, %v468_v30  ;;  %v470_v39 = vmax.f32 %v420_v32, 0.0  ;;  %v431_v43 = vadd.f32 %v738_v33, %v674_v17  ;;  %v478_v3 = vmax.f32 %v452_v62, 0.0 }
  0xf2   : > { %v422_v36 = vpop.f32.mrf.mxu0  ;;  %v454_v59 = vpop.f32.mrf.mxu1  ;;  %v463_v6 = vadd.f32 %v746_v52, %v674_v17 }
  0xf3   : > { %v485_v40 = vadd.f32 %v484_v35, %v469_v34  ;;  %v423_v41 = vadd.f32 %v674_v17, %v422_v36  ;;  %v473_v49 = vmax.f32 %v431_v43, 0.0  ;;  %v455_v1 = vadd.f32 %v674_v17, %v454_v59 }
  0xf4   : > { %v481_v10 = vmax.f32 %v463_v6, 0.0 }
  0xf5   : > { %v486_v42 = vadd.f32 %v485_v40, %v470_v39  ;;  %v471_v44 = vmax.f32 %v423_v41, 0.0  ;;  %v479_v7 = vmax.f32 %v455_v1, 0.0 }
  0xf7   : > { %v487_v48 = vadd.f32 %v486_v42, %v471_v44 }
  0xf9   : > { %v488_v50 = vadd.f32 %v487_v48, %v472_v46 }
  0xfb   : > { %v489_v55 = vadd.f32 %v488_v50, %v473_v49 }
  0xfd   : > { %v490_v58 = vadd.f32 %v489_v55, %v474_v54 }
  0xff   : > { %v491_v61 = vadd.f32 %v490_v58, %v475_v57 }
 0x101   : > { %v492_v0 = vadd.f32 %v491_v61, %v476_v60 }
 0x103   : > { %v493_v4 = vadd.f32 %v492_v0, %v477_v63 }
 0x105   : > { %v494_v5 = vadd.f32 %v493_v4, %v478_v3 }
 0x107   : > { %v495_v9 = vadd.f32 %v494_v5, %v479_v7 }
 0x109   : > { %v496_v11 = vadd.f32 %v495_v9, %v480_v8 }
 0x10b   : > { %v497_v12 = vadd.f32 %v496_v11, %v481_v10 }
 0x10d   : > { %v498_v13 = vrot.slane %v497_v12, 4 }
 0x10f   : > { %v499_v14 = vadd.f32 %v498_v13, %v497_v12 }
 0x111   : > { %v500_v15 = vrot.slane %v499_v14, 2 }
 0x113   : > { %v501_v16 = vadd.f32 %v500_v15, %v499_v14 }
 0x115   : > { %v502_v18 = vrot.slane %v501_v16, 1 }
 0x117   : > { %v503_v20 = vadd.f32 %v502_v18, %v501_v16  ;;  %509 = sbr.rel (%p694_p8) target bundleno = 513 (0x201), region = 48 }
 0x119   : > { %v504_v21 = vadd.f32 %v503_v20, %v482_v19 }
 0x11b   : > { %505 = vst [vmem:[#allocation2] sm:$0x1] %v504_v21 }
 0x11c   : > { %v527_v17 = vld [vmem:[%s1064_s3 + $0x78] sm:$0xff]  ;;  %v883_v22 = vmov 0.0   ;;  %v526_v23 = vld [vmem:[%s1064_s3 + $0x70] sm:$0xff]  ;;  %vm884_vm1 = vmmov 0   ;;  %v525_v24 = vld [vmem:[%s1064_s3 + $0x68] sm:$0xff]  ;;  %vm599_vm2 = vcmask 0  }
 0x11d   : > { %747 = vmatprep.subr.mxu0 %v883_v22  ;;  %779 = vmatprep.mubr.msk.f32.mxu0 %vm884_vm1, %v883_v22  ;;  %v524_v25 = vld [vmem:[%s1064_s3 + $0x60] sm:$0xff]  ;;  %v523_v26 = vld [vmem:[%s1064_s3 + $0x58] sm:$0xff]  ;;  %v522_v27 = vld [vmem:[%s1064_s3 + $0x50] sm:$0xff] }
 0x11e   : > { %748 = vmatpush3.msra.mxu0 %v527_v17  ;;  %v521_v28 = vld [vmem:[%s1064_s3 + $0x48] sm:$0xff]  ;;  %v520_v29 = vld [vmem:[%s1064_s3 + $0x40] sm:$0xff]  ;;  %v519_v30 = vld [vmem:[%s1064_s3 + $0x38] sm:$0xff] }
 0x11f   : > { %749 = vmatprep.subr.mxu0 %v883_v22  ;;  %v518_v31 = vld [vmem:[%s1064_s3 + $0x30] sm:$0xff]  ;;  %v517_v32 = vld [vmem:[%s1064_s3 + $0x28] sm:$0xff]  ;;  %v516_v33 = vld [vmem:[%s1064_s3 + $0x20] sm:$0xff] }
 0x120   : > { %750 = vmatpush3.msra.mxu0 %v526_v23  ;;  %v515_v34 = vld [vmem:[%s1064_s3 + $0x18] sm:$0xff]  ;;  %v514_v35 = vld [vmem:[%s1064_s3 + $0x10] sm:$0xff]  ;;  %v513_v37 = vld [vmem:[%s1064_s3 + $0x8] sm:$0xff] }
 0x121   : > { %751 = vmatprep.subr.mxu0 %v883_v22  ;;  %v512_v38 = vld [vmem:[%s1064_s3] sm:$0xff] }
 0x122   : > { %752 = vmatpush3.msra.mxu0 %v525_v24  ;;  %v510_v36 = vld [vmem:[#allocation2] sm:$0x1]  ;;  %v528_v40 = vld [vmem:[#allocation3] sm:$0x1] }
 0x123   : > { %753 = vmatprep.subr.mxu0 %v883_v22  ;;  %v511_v39 = vmul.f32 0.00390625, %v510_v36 }
 0x124   : > { %754 = vmatpush3.msra.mxu0 %v524_v25 }
 0x125   : > { %755 = vmatprep.subr.mxu0 %v883_v22 }
 0x126   : > { %756 = vmatpush3.msra.mxu0 %v523_v26 }
 0x127   : > { %757 = vmatprep.subr.mxu0 %v883_v22 }
 0x128   : > { %758 = vmatpush3.msra.mxu0 %v522_v27 }
 0x129   : > { %759 = vmatprep.subr.mxu0 %v883_v22 }
 0x12a   : > { %760 = vmatpush3.msra.mxu0 %v521_v28 }
 0x12b   : > { %761 = vmatprep.subr.mxu0 %v883_v22 }
 0x12c   : > { %762 = vmatpush3.msra.mxu0 %v520_v29 }
 0x12d   : > { %763 = vmatprep.subr.mxu0 %v883_v22 }
 0x12e   : > { %764 = vmatpush3.msra.mxu0 %v519_v30 }
 0x12f   : > { %765 = vmatprep.subr.mxu0 %v883_v22 }
 0x130   : > { %766 = vmatpush3.msra.mxu0 %v518_v31 }
 0x131   : > { %767 = vmatprep.subr.mxu0 %v883_v22 }
 0x132   : > { %768 = vmatpush3.msra.mxu0 %v517_v32 }
 0x133   : > { %769 = vmatprep.subr.mxu0 %v883_v22 }
 0x134   : > { %770 = vmatpush3.msra.mxu0 %v516_v33 }
 0x135   : > { %771 = vmatprep.subr.mxu0 %v883_v22 }
 0x136   : > { %772 = vmatpush3.msra.mxu0 %v515_v34 }
 0x137   : > { %773 = vmatprep.subr.mxu0 %v883_v22 }
 0x138   : > { %774 = vmatpush3.msra.mxu0 %v514_v35 }
 0x139   : > { %775 = vmatprep.subr.mxu0 %v883_v22 }
 0x13a   : > { %776 = vmatpush3.msra.mxu0 %v513_v37 }
 0x13b   : > { %777 = vmatprep.subr.mxu0 %v883_v22 }
 0x13c   : > { %778 = vmatpush3.msra.mxu0 %v512_v38 }
 0x13d   : > { %780 = vmatmul.mubr.f32.vlgmr.msra.gmra.mxu0 %v511_v39 }
 0x1fd   : > { %v595_v41 = vpop.f32.mrf.mxu0 }
 0x1fe   : > { %v596_v42 = vadd.f32 %v595_v41, %v528_v40 }
 0x1ff   : > { %v781_v43 = vpop.f32.mrf.mxu0 }
 0x200   : > { %600 = vst.msk [vmem:[%s250_s30] sm:$0x1] %vm599_vm2, %v596_v42 }
 0x201 PF: > { %s17_s24 = sadd.s32 1, %s880_s24   ;;  %s1067_s20 = smov %s872_s22 }
 0x202   : > { %p14_p9 = scmp.ge.s32.totalorder %s17_s24, 6   ;;  %s1068_s21 = smov %s876_s23 }
 0x203   : > { %s1069_s22 = smov %s1072_s4  ;;  %s1070_s23 = smov %s1076_s25 }
 0x204   :  { %16 = sbr.rel (!%p14_p9) target bundleno = 3 (0x3), region = 78 }

</bundles_post_ra>
